<compile_context>
chip_gen: v7x
topology: tpu7x:2x2x1
jax: 0.10.0
libtpu: 0.0.40
codegen_flags: <defaults>
</compile_context>

<pallas_src>
import functools

import jax
import jax.numpy as jnp
from jax.experimental import pallas as pl
from jax.experimental.pallas import tpu as pltpu

_DEFAULT_TIME_TILE = 2048   # output-time tile (multiple of 128, lane dense)
_HALO_BLK = 128             # halo block size along time (lane-rule compliant)
_VREG_BUDGET_ELEMS = 32 * 1024  # ~32 f32 vregs live in the tap loop


def _pick_c_block(c_in, c_block):
    if c_block is not None:
        assert c_block == c_in or (c_block > 0 and c_block % 8 == 0)
        return min(c_block, c_in)
    if c_in <= 64:
        return c_in
    return 64


def _pick_chunk(t_len, c_blk, ch_mult):
    if t_len <= 128:
        return t_len
    c = _VREG_BUDGET_ELEMS // ((ch_mult + 2) * max(c_blk, 1))
    c = max(128, min(512, (c // 128) * 128))
    return min(c, t_len)


@functools.partial(jax.jit,
                   static_argnames=("stride", "padding", "time_tile", "c_block"))
def depthwise_conv1d(x, weight, *, stride=1, padding=0,
                     time_tile=_DEFAULT_TIME_TILE, c_block=None):
    """Depthwise 1-D convolution matching nn.Conv1d(groups=in_channels, bias=False).

    Args:
      x:      (batch, in_channels, time)
      weight: (out_channels, 1, kernel_size)   (PyTorch depthwise conv weight)
    Returns:
      (batch, out_channels, time_out) in x.dtype
    """
    B, C_in, T = x.shape
    C_out, _, K = weight.shape
    assert C_out % C_in == 0, "out_channels must be a multiple of in_channels"
    assert stride >= 1 and padding >= 0
    ch_mult = C_out // C_in
    T_out = (T + 2 * padding - K) // stride + 1
    assert T_out >= 1

    in_dtype = x.dtype
    out_dtype = x.dtype

    # Weight glue (tiny): (C_out, 1, K) -> (ch_mult, C_in, K) f32,
    # with w_km[m, c, k] == weight[c*ch_mult + m, 0, k].
    w_km = jnp.transpose(
        weight[:, 0, :].reshape(C_in, ch_mult, K).astype(jnp.float32), (1, 0, 2))

    C_blk = _pick_c_block(C_in, c_block)
    n_cb = pl.cdiv(C_in, C_blk)

    H = _HALO_BLK
    L = padding
    tiled = T_out > time_tile
    if tiled:
        assert time_tile % 128 == 0
        assert padding <= H and K <= H, "kernel/padding too large for halo block"
        Tt = time_tile                       # output time per tile
        n_t = pl.cdiv(T_out, Tt)
        Tin = Tt * stride                    # main input block width (mult of 128)
        R = max(0, K - padding - stride)     # right halo lanes actually needed
        W = L + Tin + R                      # window width in VMEM
        n_main = pl.cdiv(T, Tin)
        n_h = pl.cdiv(T, H)
        hb_per_main = Tin // H
        Tcopy = None
    else:
        Tt = T_out
        n_t = 1
        Tin = n_main = n_h = hb_per_main = None
        R = 0
        W = (T_out - 1) * stride + K         # full padded window
        Tcopy = min(T, W - L)                # valid input lanes copied into window

    CHUNK = _pick_chunk(Tt, C_blk, ch_mult)
    has_left = tiled and L > 0
    has_right = tiled and R > 0

    def kernel(*refs):
        it = iter(refs)
        x_ref = next(it)
        xl_ref = next(it) if has_left else None
        xr_ref = next(it) if has_right else None
        w_ref = next(it)
        o_refs = [next(it) for _ in range(ch_mult)]
        win_ref = next(it)

        f32 = jnp.float32

        # ---- assemble the zero-padded f32 input window for this tile in VMEM ----
        if tiled:
            j = pl.program_id(2)
            base = j * Tin                   # global input index of window col L
            xm = x_ref[0]                    # (C_blk, Tin), native dtype
            in_bounds = (j + 1) * Tin <= T   # main block fully inside the input

            @pl.when(in_bounds)
            def _():
                win_ref[:, L:L + Tin] = xm.astype(f32)

            @pl.when(jnp.logical_not(in_bounds))
            def _():
                g = base + jax.lax.broadcasted_iota(jnp.int32, (C_blk, Tin), 1)
                win_ref[:, L:L + Tin] = jnp.where(
                    g < T, xm, jnp.zeros_like(xm)).astype(f32)

            if has_left:
                xl = xl_ref[0, :, H - L:]                              # (C_blk, L)
                g_l = (base - L) + jax.lax.broadcasted_iota(
                    jnp.int32, (C_blk, L), 1)
                win_ref[:, 0:L] = jnp.where(
                    (g_l >= 0) & (g_l < T), xl, jnp.zeros_like(xl)).astype(f32)
            if has_right:
                xr = xr_ref[0, :, :R]                                  # (C_blk, R)
                g_r = (base + Tin) + jax.lax.broadcasted_iota(
                    jnp.int32, (C_blk, R), 1)
                win_ref[:, L + Tin:W] = jnp.where(
                    g_r < T, xr, jnp.zeros_like(xr)).astype(f32)
        else:
            # Single tile: only the pad edges need zeroing; the middle is a copy.
            if L > 0:
                win_ref[:, 0:L] = jnp.zeros((C_blk, L), f32)
            if L + Tcopy < W:
                win_ref[:, L + Tcopy:W] = jnp.zeros((C_blk, W - L - Tcopy), f32)
            win_ref[:, L:L + Tcopy] = x_ref[0, :, :Tcopy].astype(f32)

        # ---- depthwise MAC over kernel taps, chunked along time, f32 accum ----
        w = w_ref[...]                        # (ch_mult, C_blk, K) f32
        for s0 in range(0, Tt, CHUNK):
            width = min(CHUNK, Tt - s0)
            acc = [jnp.zeros((C_blk, width), f32) for _ in range(ch_mult)]
            for k in range(K):
                start = s0 * stride + k
                if stride == 1:
                    xs = win_ref[:, start:start + width]       # (C_blk, width)
                else:
                    xs = win_ref[:, pl.ds(start, width, stride)]
                for m in range(ch_mult):
                    acc[m] = acc[m] + w[m, :, k:k + 1] * xs
            for m in range(ch_mult):
                o_refs[m][0, :, s0:s0 + width] = acc[m].astype(out_dtype)

    if tiled:
        in_specs = [pl.BlockSpec(
            (1, C_blk, Tin),
            lambda b, cb, j: (b, cb, jnp.minimum(j, n_main - 1)))]
        inputs = [x]
        if has_left:
            in_specs.append(pl.BlockSpec(
                (1, C_blk, H),
                lambda b, cb, j: (b, cb, jnp.clip(j * hb_per_main - 1, 0, n_h - 1))))
            inputs.append(x)
        if has_right:
            in_specs.append(pl.BlockSpec(
                (1, C_blk, H),
                lambda b, cb, j: (b, cb, jnp.minimum((j + 1) * hb_per_main,
                                                     n_h - 1))))
            inputs.append(x)
        in_specs.append(pl.BlockSpec((ch_mult, C_blk, K),
                                     lambda b, cb, j: (0, cb, 0)))
        inputs.append(w_km)
    else:
        in_specs = [
            pl.BlockSpec((1, C_blk, T), lambda b, cb, j: (b, cb, 0)),
            pl.BlockSpec((ch_mult, C_blk, K), lambda b, cb, j: (0, cb, 0)),
        ]
        inputs = [x, w_km]

    out_specs = [pl.BlockSpec((1, C_blk, Tt), lambda b, cb, j: (b, cb, j))
                 for _ in range(ch_mult)]
    out_shape = [jax.ShapeDtypeStruct((B, C_in, T_out), out_dtype)
                 for _ in range(ch_mult)]

    outs = pl.pallas_call(
        kernel,
        grid=(B, n_cb, n_t),
        in_specs=in_specs,
        out_specs=out_specs,
        out_shape=out_shape,
        scratch_shapes=[pltpu.VMEM((C_blk, W), jnp.float32)],
        compiler_params=pltpu.CompilerParams(
            dimension_semantics=("parallel", "parallel", "parallel"),
            vmem_limit_bytes=48 * 1024 * 1024),
    )(*inputs)

    if ch_mult == 1:
        return outs[0]
    # Interleave per-multiplier outputs back into PyTorch channel order
    # (oc = c*ch_mult + m).  Only needed when out_channels > in_channels.
    return jnp.stack(tuple(outs), axis=2).reshape(B, C_out, T_out)


def _reference(x, w, stride, padding, groups):
    return jax.lax.conv_general_dilated(
        x, w, window_strides=(stride,), padding=[(padding, padding)],
        dimension_numbers=("NCH", "OIH", "NCH"), feature_group_count=groups)


if __name__ == "__main__":
    key = jax.random.PRNGKey(0)
    keys = jax.random.split(key, 12)

    def run_case(i, B, C_in, ch_mult, T, K, stride, padding, time_tile, c_block,
                 tol):
        C_out = C_in * ch_mult
        x = jax.random.normal(keys[2 * i], (B, C_in, T), dtype=jnp.float32)
        bound = 1.0 / (K ** 0.5)
        w = jax.random.uniform(keys[2 * i + 1], (C_out, 1, K),
                               minval=-bound, maxval=bound, dtype=jnp.float32)
        out = jax.block_until_ready(
            depthwise_conv1d(x, w, stride=stride, padding=padding,
                             time_tile=time_tile, c_block=c_block))
        ref = _reference(x, w, stride, padding, C_in)
        assert out.shape == ref.shape, (i, out.shape, ref.shape)
        err = jnp.max(jnp.abs(out - ref))
        assert jnp.allclose(out, ref, atol=tol, rtol=tol), f"case {i}: err {err}"

    # 1. module-sized config (untiled, ch_mult=2, K=3, pad=1)
    run_case(0, 2, 4, 2, 16, 3, 1, 1, 2048, None, 1e-5)
    # 2. tiled path, both halos, T_out % time_tile != 0 (ch_mult=1, K=15)
    run_case(1, 2, 8, 1, 640, 15, 1, 7, 512, None, 1e-4)
    # 3. tiled, right halo dropped, 2*padding > K-1 (T_out > T), masked last tile
    run_case(2, 1, 8, 1, 600, 3, 1, 2, 512, None, 1e-5)
    # 4. tiled, left halo dropped (padding=0), right halo present
    run_case(3, 1, 8, 1, 1200, 4, 1, 0, 512, None, 1e-5)
    # 5. channel-blocked (partial last channel block) + ch_mult=2, untiled
    run_case(4, 2, 24, 2, 96, 5, 1, 2, 2048, 16, 1e-5)
    # 6. channel-blocked + tiled + both halos
    run_case(5, 1, 24, 1, 700, 9, 1, 4, 512, 16, 1e-4)

    print("KERNEL_OK")
</pallas_src>

<mosaic_0001>
module attributes {stable_mosaic.version = 11 : i64} {
  func.func @kernel(%arg0: i32, %arg1: i32, %arg2: i32, %arg3: memref<1x4x16xf32, #tpu.memory_space<vmem>>, %arg4: memref<2x4x3xf32, #tpu.memory_space<vmem>>, %arg5: memref<1x4x16xf32, #tpu.memory_space<vmem>>, %arg6: memref<1x4x16xf32, #tpu.memory_space<vmem>>, %arg7: memref<4x18xf32, #tpu.memory_space<vmem>>) attributes {dimension_semantics = [#tpu.dimension_semantics<parallel>, #tpu.dimension_semantics<parallel>, #tpu.dimension_semantics<parallel>], iteration_bounds = array<i64: 2, 1, 1>, scalar_prefetch = 0 : i64, scratch_operands = 1 : i64, tpu.core_type = #tpu.core_type<tc>, window_params = [{transform_indices = @transform_0, window_bounds = array<i64: 1, 4, 16>}, {transform_indices = @transform_1, window_bounds = array<i64: 2, 4, 3>}, {transform_indices = @transform_2, window_bounds = array<i64: 1, 4, 16>}, {transform_indices = @transform_3, window_bounds = array<i64: 1, 4, 16>}]} {
    %cst = arith.constant 0.000000e+00 : f32
    %0 = vector.broadcast %cst : f32 to vector<4x1xf32>
    %c0 = arith.constant 0 : index
    %c0_0 = arith.constant 0 : index
    %1 = vector.load %arg7[%c0, %c0_0] : memref<4x18xf32, #tpu.memory_space<vmem>>, vector<4x1xf32>
    tpu.vector_store %arg7[%c0, %c0_0], %0 {strides = array<i32>} : memref<4x18xf32, #tpu.memory_space<vmem>>, vector<4x1xf32>,
    %cst_1 = arith.constant 0.000000e+00 : f32
    %2 = vector.broadcast %cst_1 : f32 to vector<4x1xf32>
    %c0_2 = arith.constant 0 : index
    %c17 = arith.constant 17 : index
    %3 = vector.load %arg7[%c0_2, %c17] : memref<4x18xf32, #tpu.memory_space<vmem>>, vector<4x1xf32>
    tpu.vector_store %arg7[%c0_2, %c17], %2 {strides = array<i32>} : memref<4x18xf32, #tpu.memory_space<vmem>>, vector<4x1xf32>,
    %c0_3 = arith.constant 0 : index
    %c0_4 = arith.constant 0 : index
    %c0_5 = arith.constant 0 : index
    %4 = vector.load %arg3[%c0_3, %c0_4, %c0_5] : memref<1x4x16xf32, #tpu.memory_space<vmem>>, vector<1x4x16xf32>
    %5 = vector.shape_cast %4 : vector<1x4x16xf32> to vector<4x16xf32>
    %c0_6 = arith.constant 0 : index
    %c1 = arith.constant 1 : index
    %6 = vector.load %arg7[%c0_6, %c1] : memref<4x18xf32, #tpu.memory_space<vmem>>, vector<4x16xf32>
    tpu.vector_store %arg7[%c0_6, %c1], %5 {strides = array<i32>} : memref<4x18xf32, #tpu.memory_space<vmem>>, vector<4x16xf32>,
    %c0_7 = arith.constant 0 : index
    %c0_8 = arith.constant 0 : index
    %c0_9 = arith.constant 0 : index
    %7 = vector.load %arg4[%c0_7, %c0_8, %c0_9] : memref<2x4x3xf32, #tpu.memory_space<vmem>>, vector<2x4x3xf32>
    %cst_10 = arith.constant 0.000000e+00 : f32
    %8 = vector.broadcast %cst_10 : f32 to vector<4x16xf32>
    %cst_11 = arith.constant 0.000000e+00 : f32
    %9 = vector.broadcast %cst_11 : f32 to vector<4x16xf32>
    %c0_12 = arith.constant 0 : index
    %c0_13 = arith.constant 0 : index
    %10 = vector.load %arg7[%c0_12, %c0_13] : memref<4x18xf32, #tpu.memory_space<vmem>>, vector<4x16xf32>
    %11 = vector.extract_strided_slice %7 {offsets = [0, 0, 0], sizes = [1, 4, 1], strides = [1, 1, 1]} : vector<2x4x3xf32> to vector<1x4x1xf32>
    %12 = vector.shape_cast %11 : vector<1x4x1xf32> to vector<4x1xf32>
    %13 = vector.broadcast %12 : vector<4x1xf32> to vector<4x16xf32>
    %14 = arith.mulf %13, %10 : vector<4x16xf32>
    %15 = arith.addf %8, %14 : vector<4x16xf32>
    %16 = vector.extract_strided_slice %7 {offsets = [1, 0, 0], sizes = [1, 4, 1], strides = [1, 1, 1]} : vector<2x4x3xf32> to vector<1x4x1xf32>
    %17 = vector.shape_cast %16 : vector<1x4x1xf32> to vector<4x1xf32>
    %18 = vector.broadcast %17 : vector<4x1xf32> to vector<4x16xf32>
    %19 = arith.mulf %18, %10 : vector<4x16xf32>
    %20 = arith.addf %9, %19 : vector<4x16xf32>
    %c0_14 = arith.constant 0 : index
    %c1_15 = arith.constant 1 : index
    %21 = vector.load %arg7[%c0_14, %c1_15] : memref<4x18xf32, #tpu.memory_space<vmem>>, vector<4x16xf32>
    %22 = vector.extract_strided_slice %7 {offsets = [0, 0, 1], sizes = [1, 4, 1], strides = [1, 1, 1]} : vector<2x4x3xf32> to vector<1x4x1xf32>
    %23 = vector.shape_cast %22 : vector<1x4x1xf32> to vector<4x1xf32>
    %24 = vector.broadcast %23 : vector<4x1xf32> to vector<4x16xf32>
    %25 = arith.mulf %24, %21 : vector<4x16xf32>
    %26 = arith.addf %15, %25 : vector<4x16xf32>
    %27 = vector.extract_strided_slice %7 {offsets = [1, 0, 1], sizes = [1, 4, 1], strides = [1, 1, 1]} : vector<2x4x3xf32> to vector<1x4x1xf32>
    %28 = vector.shape_cast %27 : vector<1x4x1xf32> to vector<4x1xf32>
    %29 = vector.broadcast %28 : vector<4x1xf32> to vector<4x16xf32>
    %30 = arith.mulf %29, %21 : vector<4x16xf32>
    %31 = arith.addf %20, %30 : vector<4x16xf32>
    %c0_16 = arith.constant 0 : index
    %c2 = arith.constant 2 : index
    %32 = vector.load %arg7[%c0_16, %c2] : memref<4x18xf32, #tpu.memory_space<vmem>>, vector<4x16xf32>
    %33 = vector.extract_strided_slice %7 {offsets = [0, 0, 2], sizes = [1, 4, 1], strides = [1, 1, 1]} : vector<2x4x3xf32> to vector<1x4x1xf32>
    %34 = vector.shape_cast %33 : vector<1x4x1xf32> to vector<4x1xf32>
    %35 = vector.broadcast %34 : vector<4x1xf32> to vector<4x16xf32>
    %36 = arith.mulf %35, %32 : vector<4x16xf32>
    %37 = arith.addf %26, %36 : vector<4x16xf32>
    %38 = vector.extract_strided_slice %7 {offsets = [1, 0, 2], sizes = [1, 4, 1], strides = [1, 1, 1]} : vector<2x4x3xf32> to vector<1x4x1xf32>
    %39 = vector.shape_cast %38 : vector<1x4x1xf32> to vector<4x1xf32>
    %40 = vector.broadcast %39 : vector<4x1xf32> to vector<4x16xf32>
    %41 = arith.mulf %40, %32 : vector<4x16xf32>
    %42 = arith.addf %31, %41 : vector<4x16xf32>
    %c0_17 = arith.constant 0 : index
    %c0_18 = arith.constant 0 : index
    %c0_19 = arith.constant 0 : index
    %43 = vector.load %arg5[%c0_17, %c0_18, %c0_19] : memref<1x4x16xf32, #tpu.memory_space<vmem>>, vector<1x4x16xf32>
    %44 = vector.shape_cast %43 : vector<1x4x16xf32> to vector<4x16xf32>
    %45 = vector.shape_cast %37 : vector<4x16xf32> to vector<1x4x16xf32>
    tpu.vector_store %arg5[%c0_17, %c0_18, %c0_19], %45 {strides = array<i32>} : memref<1x4x16xf32, #tpu.memory_space<vmem>>, vector<1x4x16xf32>,
    %c0_20 = arith.constant 0 : index
    %c0_21 = arith.constant 0 : index
    %c0_22 = arith.constant 0 : index
    %46 = vector.load %arg6[%c0_20, %c0_21, %c0_22] : memref<1x4x16xf32, #tpu.memory_space<vmem>>, vector<1x4x16xf32>
    %47 = vector.shape_cast %46 : vector<1x4x16xf32> to vector<4x16xf32>
    %48 = vector.shape_cast %42 : vector<4x16xf32> to vector<1x4x16xf32>
    tpu.vector_store %arg6[%c0_20, %c0_21, %c0_22], %48 {strides = array<i32>} : memref<1x4x16xf32, #tpu.memory_space<vmem>>, vector<1x4x16xf32>,
    return
  }
  func.func @transform_0(%arg0: i32, %arg1: i32, %arg2: i32) -> (i32, i32, i32) {
    %c0_i32 = arith.constant 0 : i32
    %c0_i32_0 = arith.constant 0 : i32
    return %arg0, %arg1, %c0_i32 : i32, i32, i32
  }
  func.func @transform_1(%arg0: i32, %arg1: i32, %arg2: i32) -> (i32, i32, i32) {
    %c0_i32 = arith.constant 0 : i32
    %c0_i32_0 = arith.constant 0 : i32
    %c0_i32_1 = arith.constant 0 : i32
    return %c0_i32, %arg1, %c0_i32_0 : i32, i32, i32
  }
  func.func @transform_2(%arg0: i32, %arg1: i32, %arg2: i32) -> (i32, i32, i32) {
    %c0_i32 = arith.constant 0 : i32
    return %arg0, %arg1, %arg2 : i32, i32, i32
  }
  func.func @transform_3(%arg0: i32, %arg1: i32, %arg2: i32) -> (i32, i32, i32) {
    %c0_i32 = arith.constant 0 : i32
    return %arg0, %arg1, %arg2 : i32, i32, i32
  }
}

</mosaic_0001>

<bundles_post_ra>
// kernel: depthwise_conv1d.1
= control target key start
LH: loop header
LB: loop body
LE: loop exit
PB: predicated region body
PF: predicated region fallthrough
CT: control target
= control target key end

     0   :  { %s580_s12 = smov 0   ;;  %s582_s13 = smov 0   ;;  %s627_s0 = inlined_call_operand.vmem [shape: f32[2,4,16], index: 0, kind: input, shape index: {}]   ;;  %s628_s1 = inlined_call_operand.vmem [shape: f32[2,4,3], index: 1, kind: input, shape index: {}]   ;;  %s629_s2 = inlined_call_operand.vmem [shape: f32[2,4,16], index: 2, kind: output, shape index: {0}]   ;;  %s630_s3 = inlined_call_operand.vmem [shape: f32[2,4,16], index: 3, kind: output, shape index: {1}]  }
   0x1   :  { %s584_s14 = smov 0  }
   0x2 LB: > { %s33_s15 = sadd.s32 1, %s547_s13  ;;  %p486_p0 = scmp.ge.s32.totalorder %s551_s14, 1  ;;  %s551_s14 = sphi %s584_s14, %s14_s14   ;;  %s547_s13 = sphi %s582_s13, %s632_s13   ;;  %s543_s12 = sphi %s580_s12, %s631_s12  }
   0x3   : > { %p35_p1 = scmp.ge.s32.totalorder %s33_s15, 2  ;;  %p180_p2 = scmp.lt.s32.totalorder %s551_s14, 3 }
   0x5   : > { %s634_s15 = smov (%p35_p1, %s33_s15), 0  ;;  %p181_p3 = pnand %p486_p0, %p180_p2 }
   0x6   : > { %v268_v0 = vld [vmem:[%s628_s1 + $0x4] sm:$0xf] (!%p181_p3)  ;;  %v553_v1 = vmov (!%p181_p3), 1   ;;  %p225_p4 = scmp.lt.s32.totalorder (!%p181_p3), %s543_s12, 1  ;;  %vm256_vm0 = vcmask (!%p181_p3), 3072   ;;  %vm258_vm1 = vcmask (!%p181_p3), 142472  }
   0x7   : > { %184 = sbr.rel (%p181_p3) target bundleno = 274 (0x112), region = 28  ;;  %524 = vset.pattern.permute.xlu1 (!%p181_p3), %v553_v1  ;;  %523 = vset.pattern.permute.xlu0 (!%p181_p3), %v553_v1  ;;  %v554_v2 = vmov (!%p181_p3), 0.0   ;;  %v267_v3 = vld [vmem:[%s628_s1] sm:$0xf] (!%p181_p3)  ;;  %v555_v4 = vmov (!%p181_p3), 2   ;;  %s556_s24 = smov (!%p181_p3), 1  }
   0x8   : > { %295 = vperm.xlu1 (!%p181_p3), %524, %v268_v0   ;;  %257 = vst.msk [vmem:[#allocation2] sm:$0xf] (!%p181_p3), %vm256_vm0, %v554_v2  ;;  %v557_v6 = vmov (!%p181_p3), 0   ;;  %vm265_vm2 = vcmask (!%p181_p3), 134152   ;;  %s558_s25 = smov (!%p181_p3), 127   ;;  %s559_s26 = smov (!%p181_p3), 126  }
   0x9   : > { %259 = vst.msk [vmem:[#allocation2] sm:$0xf] (!%p181_p3), %vm258_vm1, %v554_v2  ;;  %vm324_vm3 = vcmask (!%p181_p3), 125952  }
   0xc   : > { %525 = vset.pattern.permute.xlu1 (!%p181_p3), %v555_v4 }
   0xd   : > { %305 = vperm.xlu1 (!%p181_p3), %525, %v267_v3  }
   0xe   : > { %s636_s12 = smov (!%p225_p4, %s543_s12), 1 }
   0xf   : > { %s604_s20 = sshll.u32 %s636_s12, 2 }
  0x10   : > { %s231_s23 = scalar_lea.vmem %s627_s0, %s604_s20  ;;  %s255_s29 = scalar_lea.vmem %s630_s3, %s604_s20 }
  0x11   : > { %v260_v5 = vld [vmem:[%s231_s23] sm:$0xf]  ;;  %315 = vperm.xlu1 %525, %v268_v0   ;;  %s245_s5 = scalar_lea.vmem %s629_s2, %s604_s20 }
  0x12   : > { %262 = vrot.lane.b32.xlu0 %v260_v5, %s556_s24 }
  0x15   : > { %527 = vset.pattern.permute.xlu1 %v557_v6 }
  0x16   : > { %285 = vperm.xlu0 %523, %v267_v3   ;;  %279 = vperm.xlu1 %527, %v268_v0  }
  0x1a   : > { %526 = vset.pattern.permute.xlu0 %v557_v6 }
  0x1b   : > { %272 = vperm.xlu0 %526, %v267_v3  }
  0x1f   : > { %528 = vset.pattern.permute.xlu0 %v555_v4 }
  0x84   : > { %v263_v7 = vpop.permute.xlu0 %262 }
  0x85   : > { %266 = vst.msk [vmem:[#allocation2] sm:$0xf] %vm265_vm2, %v263_v7 }
  0x87   : > { %v296_v8 = vpop.permute.xlu1 %295 }
  0x8c   : > { %v269_v9 = vld [vmem:[#allocation2] sm:$0xf]  ;;  %v306_v11 = vpop.permute.xlu1 %305 }
  0x8d   : > { %v298_v10 = vmul.f32 %v296_v8, %v269_v9  ;;  %v308_v16 = vmul.f32 %v306_v11, %v269_v9 }
  0x8f   : > { %300 = vrot.lane.b32.xlu0 %v298_v10, %s558_s25 }
  0x90   : > { %v316_v12 = vpop.permute.xlu1 %315 }
  0x91   : > { %v318_v13 = vmul.f32 %v316_v12, %v269_v9 }
  0x93   : > { %320 = vrot.lane.b32.xlu0 %v318_v13, %s559_s26 }
  0x95   : > { %v286_v14 = vpop.permute.xlu0 %285  ;;  %v280_v18 = vpop.permute.xlu1 %279 }
  0x96   : > { %v288_v15 = vmul.f32 %v286_v14, %v269_v9  ;;  %v282_v20 = vmul.f32 %v280_v18, %v269_v9 }
  0x98   : > { %290 = vrot.lane.b32.xlu1 %v288_v15, %s558_s25 }
  0x9a   : > { %v273_v17 = vpop.permute.xlu0 %272 }
  0x9b   : > { %v275_v25 = vmul.f32 %v273_v17, %v269_v9 }
  0x9c   : > { %310 = vrot.lane.b32.xlu1 %v308_v16, %s559_s26 }
 0x101   : > { %v301_v19 = vpop.permute.xlu0 %300 }
 0x102   : > { %v303_v21 = vadd.f32 %v301_v19, %v282_v20 }
 0x105   : > { %v321_v22 = vpop.permute.xlu0 %320 }
 0x106   : > { %v323_v24 = vadd.f32 %v321_v22, %v303_v21 }
 0x108   : > { %326 = vst.msk [vmem:[%s255_s29] sm:$0xf] %vm324_vm3, %v323_v24 }
 0x10a   : > { %v291_v23 = vpop.permute.xlu1 %290 }
 0x10b   : > { %v293_v26 = vadd.f32 %v291_v23, %v275_v25 }
 0x10e   : > { %v311_v27 = vpop.permute.xlu1 %310 }
 0x10f   : > { %v313_v28 = vadd.f32 %v311_v27, %v293_v26 }
 0x111   : > { %325 = vst.msk [vmem:[%s245_s5] sm:$0xf] %vm324_vm3, %v313_v28 }
 0x112 PF: > { %s14_s14 = sadd.s32 1, %s551_s14   ;;  %s631_s12 = smov %s547_s13 }
 0x113   : > { %p11_p5 = scmp.ge.s32.totalorder %s14_s14, 4   ;;  %s632_s13 = smov %s634_s15 }
 0x115   :  { %13 = sbr.rel (!%p11_p5) target bundleno = 2 (0x2), region = 73 }

</bundles_post_ra>
